<compile_context>
chip_gen: v5e
topology: v5e:2x2
jax: 0.10.0
libtpu: 0.0.40
codegen_flags: <defaults>
</compile_context>

<pallas_src>
import functools

import jax
import jax.numpy as jnp
from jax.experimental import pallas as pl
from jax.experimental.pallas import tpu as pltpu


def _kv_gather_kernel(p2, topk, mul_weight, *refs):
    if mul_weight == "soft":
        idx_ref, kv_ref, w_ref, out_ref = refs
    else:
        idx_ref, kv_ref, out_ref = refs
        w_ref = None

    b = pl.program_id(0)
    rows = p2 * topk
    base = b * rows  # flat offset into the 1D SMEM index table

    # Read all SMEM scalars up front (before any vector work / stores).
    srcs = [idx_ref[base + r] for r in range(rows)]

    # Gather: each output row is a dynamic sublane slice of the in-VMEM kv[b]
    # slab, written directly into the (lane-dense) output block.
    for r in range(rows):
        out_ref[0, pl.ds(r, 1), :] = kv_ref[0, pl.ds(srcs[r], 1), :].astype(
            out_ref.dtype
        )

    if mul_weight == "soft":
        # Single vectorized scale: one broadcast, one dense multiply, one dense store.
        out_ref[0] = out_ref[0] * w_ref[0]


def kv_gather(r_idx, r_weight, kv, mul_weight="none"):
    """Pallas equivalent of KVGather.forward."""
    assert mul_weight in ("none", "soft", "hard")
    if mul_weight == "hard":
        # TODO(synk): differentiable hard routing is NotImplemented in the PyTorch source too.
        raise NotImplementedError("differentiable hard routing TBA")

    n, p2, w2, c_kv = kv.shape
    topk = r_idx.shape[-1]
    w2c = w2 * c_kv
    rows = p2 * topk

    # Lane-dense minor dim: pad w2*c_kv to a multiple of 128 so loads/stores and
    # the writeback DMA stay unmasked for general shapes (no-op at 128 multiples).
    w2c_pad = ((w2c + 127) // 128) * 128

    kv_flat = kv.reshape(n, p2, w2c)
    if w2c_pad != w2c:
        kv_flat = jnp.pad(kv_flat, ((0, 0), (0, 0), (0, w2c_pad - w2c)))

    # Clamp indices (see NOTE above) and flatten the SMEM table to 1D to avoid
    # multi-dim SMEM padding.
    idx_flat = jnp.clip(r_idx.astype(jnp.int32), 0, p2 - 1).reshape(-1)

    if mul_weight == "soft":
        out_dtype = jnp.result_type(kv.dtype, r_weight.dtype)
        # Weights as a lane-broadcastable VMEM block in the promoted dtype
        # (not SMEM scalars -> no 32-bit-path conversion issues).
        w_arg = r_weight.astype(out_dtype).reshape(n, rows, 1)
        in_specs = [
            pl.BlockSpec((1, p2, w2c_pad), lambda b, idx: (b, 0, 0)),
            pl.BlockSpec((1, rows, 1), lambda b, idx: (b, 0, 0)),
        ]
        args = (idx_flat, kv_flat, w_arg)
    else:
        out_dtype = kv.dtype
        in_specs = [pl.BlockSpec((1, p2, w2c_pad), lambda b, idx: (b, 0, 0))]
        args = (idx_flat, kv_flat)

    grid_spec = pltpu.PrefetchScalarGridSpec(
        num_scalar_prefetch=1,
        grid=(n,),
        in_specs=in_specs,
        out_specs=pl.BlockSpec((1, rows, w2c_pad), lambda b, idx: (b, 0, 0)),
    )

    out_itemsize = jnp.dtype(out_dtype).itemsize
    bytes_accessed = (
        n * p2 * w2c_pad * kv.dtype.itemsize      # kv tiles read
        + n * rows * w2c_pad * out_itemsize       # output written
        + idx_flat.size * 4                       # index table
    )
    flops = 0
    if mul_weight == "soft":
        flops = n * rows * w2c_pad
        bytes_accessed += n * rows * out_itemsize  # weight block
    cost = pl.CostEstimate(
        flops=flops, transcendentals=0, bytes_accessed=bytes_accessed
    )

    kernel = functools.partial(_kv_gather_kernel, p2, topk, mul_weight)

    out_flat = pl.pallas_call(
        kernel,
        out_shape=jax.ShapeDtypeStruct((n, rows, w2c_pad), out_dtype),
        grid_spec=grid_spec,
        compiler_params=pltpu.CompilerParams(
            dimension_semantics=("parallel",),
        ),
        cost_estimate=cost,
    )(*args)

    if w2c_pad != w2c:
        out_flat = out_flat[..., :w2c]
    return out_flat.reshape(n, p2, topk, w2, c_kv)


def kv_gather_ref(r_idx, r_weight, kv, mul_weight="none"):
    """Pure-JAX reference matching the PyTorch semantics."""
    gathered = jnp.take_along_axis(
        kv[:, None],                                    # (n, 1, p2, w2, c_kv)
        r_idx[:, :, :, None, None].astype(jnp.int32),   # (n, p2, topk, 1, 1)
        axis=2,
    )                                                   # (n, p2, topk, w2, c_kv)
    if mul_weight == "soft":
        gathered = r_weight[:, :, :, None, None] * gathered
    return gathered


if __name__ == "__main__":
    key = jax.random.PRNGKey(0)
    k1, k2, k3 = jax.random.split(key, 3)

    n, p2, topk, w2, c_kv = 2, 8, 4, 16, 64

    kv = jax.random.normal(k1, (n, p2, w2, c_kv), dtype=jnp.float32)
    r_idx = jax.random.randint(k2, (n, p2, topk), 0, p2, dtype=jnp.int32)
    r_weight = jax.nn.softmax(
        jax.random.normal(k3, (n, p2, topk), dtype=jnp.float32), axis=-1
    )

    ok = True
    for mode in ("none", "soft"):
        out = kv_gather(r_idx, r_weight, kv, mul_weight=mode)
        out = jax.block_until_ready(out)
        ref = kv_gather_ref(r_idx, r_weight, kv, mul_weight=mode)
        ok = ok and bool(jnp.allclose(out, ref, atol=1e-5, rtol=1e-5))

    # Exercise the pure-gather path with a narrower dtype as well (exact copy).
    kv_bf16 = kv.astype(jnp.bfloat16)
    out_b = jax.block_until_ready(kv_gather(r_idx, r_weight, kv_bf16, "none"))
    ref_b = kv_gather_ref(r_idx, r_weight, kv_bf16, "none")
    ok = ok and bool(jnp.all(out_b == ref_b))

    if ok:
        print("KERNEL_OK")
    else:
        print("KERNEL_MISMATCH")
</pallas_src>

<mosaic_0001>
module attributes {stable_mosaic.version = 11 : i64} {
  func.func @_kv_gather_kernel(%arg0: i32, %arg1: memref<64xi32, #tpu.memory_space<smem>>, %arg2: memref<1x8x1024xf32, #tpu.memory_space<vmem>>, %arg3: memref<1x32x1024xf32, #tpu.memory_space<vmem>>) attributes {dimension_semantics = [#tpu.dimension_semantics<parallel>], iteration_bounds = array<i64: 2>, scalar_prefetch = 1 : i64, scratch_operands = 0 : i64, tpu.core_type = #tpu.core_type<tc>, window_params = [{transform_indices = @transform_0, window_bounds = array<i64: 1, 8, 1024>}, {transform_indices = @transform_1, window_bounds = array<i64: 1, 32, 1024>}]} {
    %c32_i32 = arith.constant 32 : i32
    %0 = arith.muli %arg0, %c32_i32 : i32
    %c0_i32 = arith.constant 0 : i32
    %1 = arith.addi %0, %c0_i32 : i32
    %2 = arith.index_cast %1 : i32 to index
    %3 = memref.load %arg1[%2] : memref<64xi32, #tpu.memory_space<smem>>
    %c1_i32 = arith.constant 1 : i32
    %4 = arith.addi %0, %c1_i32 : i32
    %5 = arith.index_cast %4 : i32 to index
    %6 = memref.load %arg1[%5] : memref<64xi32, #tpu.memory_space<smem>>
    %c2_i32 = arith.constant 2 : i32
    %7 = arith.addi %0, %c2_i32 : i32
    %8 = arith.index_cast %7 : i32 to index
    %9 = memref.load %arg1[%8] : memref<64xi32, #tpu.memory_space<smem>>
    %c3_i32 = arith.constant 3 : i32
    %10 = arith.addi %0, %c3_i32 : i32
    %11 = arith.index_cast %10 : i32 to index
    %12 = memref.load %arg1[%11] : memref<64xi32, #tpu.memory_space<smem>>
    %c4_i32 = arith.constant 4 : i32
    %13 = arith.addi %0, %c4_i32 : i32
    %14 = arith.index_cast %13 : i32 to index
    %15 = memref.load %arg1[%14] : memref<64xi32, #tpu.memory_space<smem>>
    %c5_i32 = arith.constant 5 : i32
    %16 = arith.addi %0, %c5_i32 : i32
    %17 = arith.index_cast %16 : i32 to index
    %18 = memref.load %arg1[%17] : memref<64xi32, #tpu.memory_space<smem>>
    %c6_i32 = arith.constant 6 : i32
    %19 = arith.addi %0, %c6_i32 : i32
    %20 = arith.index_cast %19 : i32 to index
    %21 = memref.load %arg1[%20] : memref<64xi32, #tpu.memory_space<smem>>
    %c7_i32 = arith.constant 7 : i32
    %22 = arith.addi %0, %c7_i32 : i32
    %23 = arith.index_cast %22 : i32 to index
    %24 = memref.load %arg1[%23] : memref<64xi32, #tpu.memory_space<smem>>
    %c8_i32 = arith.constant 8 : i32
    %25 = arith.addi %0, %c8_i32 : i32
    %26 = arith.index_cast %25 : i32 to index
    %27 = memref.load %arg1[%26] : memref<64xi32, #tpu.memory_space<smem>>
    %c9_i32 = arith.constant 9 : i32
    %28 = arith.addi %0, %c9_i32 : i32
    %29 = arith.index_cast %28 : i32 to index
    %30 = memref.load %arg1[%29] : memref<64xi32, #tpu.memory_space<smem>>
    %c10_i32 = arith.constant 10 : i32
    %31 = arith.addi %0, %c10_i32 : i32
    %32 = arith.index_cast %31 : i32 to index
    %33 = memref.load %arg1[%32] : memref<64xi32, #tpu.memory_space<smem>>
    %c11_i32 = arith.constant 11 : i32
    %34 = arith.addi %0, %c11_i32 : i32
    %35 = arith.index_cast %34 : i32 to index
    %36 = memref.load %arg1[%35] : memref<64xi32, #tpu.memory_space<smem>>
    %c12_i32 = arith.constant 12 : i32
    %37 = arith.addi %0, %c12_i32 : i32
    %38 = arith.index_cast %37 : i32 to index
    %39 = memref.load %arg1[%38] : memref<64xi32, #tpu.memory_space<smem>>
    %c13_i32 = arith.constant 13 : i32
    %40 = arith.addi %0, %c13_i32 : i32
    %41 = arith.index_cast %40 : i32 to index
    %42 = memref.load %arg1[%41] : memref<64xi32, #tpu.memory_space<smem>>
    %c14_i32 = arith.constant 14 : i32
    %43 = arith.addi %0, %c14_i32 : i32
    %44 = arith.index_cast %43 : i32 to index
    %45 = memref.load %arg1[%44] : memref<64xi32, #tpu.memory_space<smem>>
    %c15_i32 = arith.constant 15 : i32
    %46 = arith.addi %0, %c15_i32 : i32
    %47 = arith.index_cast %46 : i32 to index
    %48 = memref.load %arg1[%47] : memref<64xi32, #tpu.memory_space<smem>>
    %c16_i32 = arith.constant 16 : i32
    %49 = arith.addi %0, %c16_i32 : i32
    %50 = arith.index_cast %49 : i32 to index
    %51 = memref.load %arg1[%50] : memref<64xi32, #tpu.memory_space<smem>>
    %c17_i32 = arith.constant 17 : i32
    %52 = arith.addi %0, %c17_i32 : i32
    %53 = arith.index_cast %52 : i32 to index
    %54 = memref.load %arg1[%53] : memref<64xi32, #tpu.memory_space<smem>>
    %c18_i32 = arith.constant 18 : i32
    %55 = arith.addi %0, %c18_i32 : i32
    %56 = arith.index_cast %55 : i32 to index
    %57 = memref.load %arg1[%56] : memref<64xi32, #tpu.memory_space<smem>>
    %c19_i32 = arith.constant 19 : i32
    %58 = arith.addi %0, %c19_i32 : i32
    %59 = arith.index_cast %58 : i32 to index
    %60 = memref.load %arg1[%59] : memref<64xi32, #tpu.memory_space<smem>>
    %c20_i32 = arith.constant 20 : i32
    %61 = arith.addi %0, %c20_i32 : i32
    %62 = arith.index_cast %61 : i32 to index
    %63 = memref.load %arg1[%62] : memref<64xi32, #tpu.memory_space<smem>>
    %c21_i32 = arith.constant 21 : i32
    %64 = arith.addi %0, %c21_i32 : i32
    %65 = arith.index_cast %64 : i32 to index
    %66 = memref.load %arg1[%65] : memref<64xi32, #tpu.memory_space<smem>>
    %c22_i32 = arith.constant 22 : i32
    %67 = arith.addi %0, %c22_i32 : i32
    %68 = arith.index_cast %67 : i32 to index
    %69 = memref.load %arg1[%68] : memref<64xi32, #tpu.memory_space<smem>>
    %c23_i32 = arith.constant 23 : i32
    %70 = arith.addi %0, %c23_i32 : i32
    %71 = arith.index_cast %70 : i32 to index
    %72 = memref.load %arg1[%71] : memref<64xi32, #tpu.memory_space<smem>>
    %c24_i32 = arith.constant 24 : i32
    %73 = arith.addi %0, %c24_i32 : i32
    %74 = arith.index_cast %73 : i32 to index
    %75 = memref.load %arg1[%74] : memref<64xi32, #tpu.memory_space<smem>>
    %c25_i32 = arith.constant 25 : i32
    %76 = arith.addi %0, %c25_i32 : i32
    %77 = arith.index_cast %76 : i32 to index
    %78 = memref.load %arg1[%77] : memref<64xi32, #tpu.memory_space<smem>>
    %c26_i32 = arith.constant 26 : i32
    %79 = arith.addi %0, %c26_i32 : i32
    %80 = arith.index_cast %79 : i32 to index
    %81 = memref.load %arg1[%80] : memref<64xi32, #tpu.memory_space<smem>>
    %c27_i32 = arith.constant 27 : i32
    %82 = arith.addi %0, %c27_i32 : i32
    %83 = arith.index_cast %82 : i32 to index
    %84 = memref.load %arg1[%83] : memref<64xi32, #tpu.memory_space<smem>>
    %c28_i32 = arith.constant 28 : i32
    %85 = arith.addi %0, %c28_i32 : i32
    %86 = arith.index_cast %85 : i32 to index
    %87 = memref.load %arg1[%86] : memref<64xi32, #tpu.memory_space<smem>>
    %c29_i32 = arith.constant 29 : i32
    %88 = arith.addi %0, %c29_i32 : i32
    %89 = arith.index_cast %88 : i32 to index
    %90 = memref.load %arg1[%89] : memref<64xi32, #tpu.memory_space<smem>>
    %c30_i32 = arith.constant 30 : i32
    %91 = arith.addi %0, %c30_i32 : i32
    %92 = arith.index_cast %91 : i32 to index
    %93 = memref.load %arg1[%92] : memref<64xi32, #tpu.memory_space<smem>>
    %c31_i32 = arith.constant 31 : i32
    %94 = arith.addi %0, %c31_i32 : i32
    %95 = arith.index_cast %94 : i32 to index
    %96 = memref.load %arg1[%95] : memref<64xi32, #tpu.memory_space<smem>>
    %c0 = arith.constant 0 : index
    %97 = arith.index_cast %3 : i32 to index
    %c0_0 = arith.constant 0 : index
    %98 = vector.load %arg2[%c0, %97, %c0_0] : memref<1x8x1024xf32, #tpu.memory_space<vmem>>, vector<1x1x1024xf32>
    %99 = vector.shape_cast %98 : vector<1x1x1024xf32> to vector<1x1024xf32>
    %c0_1 = arith.constant 0 : index
    %c0_2 = arith.constant 0 : index
    %c0_3 = arith.constant 0 : index
    %100 = vector.load %arg3[%c0_1, %c0_2, %c0_3] : memref<1x32x1024xf32, #tpu.memory_space<vmem>>, vector<1x1x1024xf32>
    %101 = vector.shape_cast %100 : vector<1x1x1024xf32> to vector<1x1024xf32>
    %102 = vector.shape_cast %99 : vector<1x1024xf32> to vector<1x1x1024xf32>
    tpu.vector_store %arg3[%c0_1, %c0_2, %c0_3], %102 {strides = array<i32>} : memref<1x32x1024xf32, #tpu.memory_space<vmem>>, vector<1x1x1024xf32>,
    %c0_4 = arith.constant 0 : index
    %103 = arith.index_cast %6 : i32 to index
    %c0_5 = arith.constant 0 : index
    %104 = vector.load %arg2[%c0_4, %103, %c0_5] : memref<1x8x1024xf32, #tpu.memory_space<vmem>>, vector<1x1x1024xf32>
    %105 = vector.shape_cast %104 : vector<1x1x1024xf32> to vector<1x1024xf32>
    %c0_6 = arith.constant 0 : index
    %c1 = arith.constant 1 : index
    %c0_7 = arith.constant 0 : index
    %106 = vector.load %arg3[%c0_6, %c1, %c0_7] : memref<1x32x1024xf32, #tpu.memory_space<vmem>>, vector<1x1x1024xf32>
    %107 = vector.shape_cast %106 : vector<1x1x1024xf32> to vector<1x1024xf32>
    %108 = vector.shape_cast %105 : vector<1x1024xf32> to vector<1x1x1024xf32>
    tpu.vector_store %arg3[%c0_6, %c1, %c0_7], %108 {strides = array<i32>} : memref<1x32x1024xf32, #tpu.memory_space<vmem>>, vector<1x1x1024xf32>,
    %c0_8 = arith.constant 0 : index
    %109 = arith.index_cast %9 : i32 to index
    %c0_9 = arith.constant 0 : index
    %110 = vector.load %arg2[%c0_8, %109, %c0_9] : memref<1x8x1024xf32, #tpu.memory_space<vmem>>, vector<1x1x1024xf32>
    %111 = vector.shape_cast %110 : vector<1x1x1024xf32> to vector<1x1024xf32>
    %c0_10 = arith.constant 0 : index
    %c2 = arith.constant 2 : index
    %c0_11 = arith.constant 0 : index
    %112 = vector.load %arg3[%c0_10, %c2, %c0_11] : memref<1x32x1024xf32, #tpu.memory_space<vmem>>, vector<1x1x1024xf32>
    %113 = vector.shape_cast %112 : vector<1x1x1024xf32> to vector<1x1024xf32>
    %114 = vector.shape_cast %111 : vector<1x1024xf32> to vector<1x1x1024xf32>
    tpu.vector_store %arg3[%c0_10, %c2, %c0_11], %114 {strides = array<i32>} : memref<1x32x1024xf32, #tpu.memory_space<vmem>>, vector<1x1x1024xf32>,
    %c0_12 = arith.constant 0 : index
    %115 = arith.index_cast %12 : i32 to index
    %c0_13 = arith.constant 0 : index
    %116 = vector.load %arg2[%c0_12, %115, %c0_13] : memref<1x8x1024xf32, #tpu.memory_space<vmem>>, vector<1x1x1024xf32>
    %117 = vector.shape_cast %116 : vector<1x1x1024xf32> to vector<1x1024xf32>
    %c0_14 = arith.constant 0 : index
    %c3 = arith.constant 3 : index
    %c0_15 = arith.constant 0 : index
    %118 = vector.load %arg3[%c0_14, %c3, %c0_15] : memref<1x32x1024xf32, #tpu.memory_space<vmem>>, vector<1x1x1024xf32>
    %119 = vector.shape_cast %118 : vector<1x1x1024xf32> to vector<1x1024xf32>
    %120 = vector.shape_cast %117 : vector<1x1024xf32> to vector<1x1x1024xf32>
    tpu.vector_store %arg3[%c0_14, %c3, %c0_15], %120 {strides = array<i32>} : memref<1x32x1024xf32, #tpu.memory_space<vmem>>, vector<1x1x1024xf32>,
    %c0_16 = arith.constant 0 : index
    %121 = arith.index_cast %15 : i32 to index
    %c0_17 = arith.constant 0 : index
    %122 = vector.load %arg2[%c0_16, %121, %c0_17] : memref<1x8x1024xf32, #tpu.memory_space<vmem>>, vector<1x1x1024xf32>
    %123 = vector.shape_cast %122 : vector<1x1x1024xf32> to vector<1x1024xf32>
    %c0_18 = arith.constant 0 : index
    %c4 = arith.constant 4 : index
    %c0_19 = arith.constant 0 : index
    %124 = vector.load %arg3[%c0_18, %c4, %c0_19] : memref<1x32x1024xf32, #tpu.memory_space<vmem>>, vector<1x1x1024xf32>
    %125 = vector.shape_cast %124 : vector<1x1x1024xf32> to vector<1x1024xf32>
    %126 = vector.shape_cast %123 : vector<1x1024xf32> to vector<1x1x1024xf32>
    tpu.vector_store %arg3[%c0_18, %c4, %c0_19], %126 {strides = array<i32>} : memref<1x32x1024xf32, #tpu.memory_space<vmem>>, vector<1x1x1024xf32>,
    %c0_20 = arith.constant 0 : index
    %127 = arith.index_cast %18 : i32 to index
    %c0_21 = arith.constant 0 : index
    %128 = vector.load %arg2[%c0_20, %127, %c0_21] : memref<1x8x1024xf32, #tpu.memory_space<vmem>>, vector<1x1x1024xf32>
    %129 = vector.shape_cast %128 : vector<1x1x1024xf32> to vector<1x1024xf32>
    %c0_22 = arith.constant 0 : index
    %c5 = arith.constant 5 : index
    %c0_23 = arith.constant 0 : index
    %130 = vector.load %arg3[%c0_22, %c5, %c0_23] : memref<1x32x1024xf32, #tpu.memory_space<vmem>>, vector<1x1x1024xf32>
    %131 = vector.shape_cast %130 : vector<1x1x1024xf32> to vector<1x1024xf32>
    %132 = vector.shape_cast %129 : vector<1x1024xf32> to vector<1x1x1024xf32>
    tpu.vector_store %arg3[%c0_22, %c5, %c0_23], %132 {strides = array<i32>} : memref<1x32x1024xf32, #tpu.memory_space<vmem>>, vector<1x1x1024xf32>,
    %c0_24 = arith.constant 0 : index
    %133 = arith.index_cast %21 : i32 to index
    %c0_25 = arith.constant 0 : index
    %134 = vector.load %arg2[%c0_24, %133, %c0_25] : memref<1x8x1024xf32, #tpu.memory_space<vmem>>, vector<1x1x1024xf32>
    %135 = vector.shape_cast %134 : vector<1x1x1024xf32> to vector<1x1024xf32>
    %c0_26 = arith.constant 0 : index
    %c6 = arith.constant 6 : index
    %c0_27 = arith.constant 0 : index
    %136 = vector.load %arg3[%c0_26, %c6, %c0_27] : memref<1x32x1024xf32, #tpu.memory_space<vmem>>, vector<1x1x1024xf32>
    %137 = vector.shape_cast %136 : vector<1x1x1024xf32> to vector<1x1024xf32>
    %138 = vector.shape_cast %135 : vector<1x1024xf32> to vector<1x1x1024xf32>
    tpu.vector_store %arg3[%c0_26, %c6, %c0_27], %138 {strides = array<i32>} : memref<1x32x1024xf32, #tpu.memory_space<vmem>>, vector<1x1x1024xf32>,
    %c0_28 = arith.constant 0 : index
    %139 = arith.index_cast %24 : i32 to index
    %c0_29 = arith.constant 0 : index
    %140 = vector.load %arg2[%c0_28, %139, %c0_29] : memref<1x8x1024xf32, #tpu.memory_space<vmem>>, vector<1x1x1024xf32>
    %141 = vector.shape_cast %140 : vector<1x1x1024xf32> to vector<1x1024xf32>
    %c0_30 = arith.constant 0 : index
    %c7 = arith.constant 7 : index
    %c0_31 = arith.constant 0 : index
    %142 = vector.load %arg3[%c0_30, %c7, %c0_31] : memref<1x32x1024xf32, #tpu.memory_space<vmem>>, vector<1x1x1024xf32>
    %143 = vector.shape_cast %142 : vector<1x1x1024xf32> to vector<1x1024xf32>
    %144 = vector.shape_cast %141 : vector<1x1024xf32> to vector<1x1x1024xf32>
    tpu.vector_store %arg3[%c0_30, %c7, %c0_31], %144 {strides = array<i32>} : memref<1x32x1024xf32, #tpu.memory_space<vmem>>, vector<1x1x1024xf32>,
    %c0_32 = arith.constant 0 : index
    %145 = arith.index_cast %27 : i32 to index
    %c0_33 = arith.constant 0 : index
    %146 = vector.load %arg2[%c0_32, %145, %c0_33] : memref<1x8x1024xf32, #tpu.memory_space<vmem>>, vector<1x1x1024xf32>
    %147 = vector.shape_cast %146 : vector<1x1x1024xf32> to vector<1x1024xf32>
    %c0_34 = arith.constant 0 : index
    %c8 = arith.constant 8 : index
    %c0_35 = arith.constant 0 : index
    %148 = vector.load %arg3[%c0_34, %c8, %c0_35] : memref<1x32x1024xf32, #tpu.memory_space<vmem>>, vector<1x1x1024xf32>
    %149 = vector.shape_cast %148 : vector<1x1x1024xf32> to vector<1x1024xf32>
    %150 = vector.shape_cast %147 : vector<1x1024xf32> to vector<1x1x1024xf32>
    tpu.vector_store %arg3[%c0_34, %c8, %c0_35], %150 {strides = array<i32>} : memref<1x32x1024xf32, #tpu.memory_space<vmem>>, vector<1x1x1024xf32>,
    %c0_36 = arith.constant 0 : index
    %151 = arith.index_cast %30 : i32 to index
    %c0_37 = arith.constant 0 : index
    %152 = vector.load %arg2[%c0_36, %151, %c0_37] : memref<1x8x1024xf32, #tpu.memory_space<vmem>>, vector<1x1x1024xf32>
    %153 = vector.shape_cast %152 : vector<1x1x1024xf32> to vector<1x1024xf32>
    %c0_38 = arith.constant 0 : index
    %c9 = arith.constant 9 : index
    %c0_39 = arith.constant 0 : index
    %154 = vector.load %arg3[%c0_38, %c9, %c0_39] : memref<1x32x1024xf32, #tpu.memory_space<vmem>>, vector<1x1x1024xf32>
    %155 = vector.shape_cast %154 : vector<1x1x1024xf32> to vector<1x1024xf32>
    %156 = vector.shape_cast %153 : vector<1x1024xf32> to vector<1x1x1024xf32>
    tpu.vector_store %arg3[%c0_38, %c9, %c0_39], %156 {strides = array<i32>} : memref<1x32x1024xf32, #tpu.memory_space<vmem>>, vector<1x1x1024xf32>,
    %c0_40 = arith.constant 0 : index
    %157 = arith.index_cast %33 : i32 to index
    %c0_41 = arith.constant 0 : index
    %158 = vector.load %arg2[%c0_40, %157, %c0_41] : memref<1x8x1024xf32, #tpu.memory_space<vmem>>, vector<1x1x1024xf32>
    %159 = vector.shape_cast %158 : vector<1x1x1024xf32> to vector<1x1024xf32>
    %c0_42 = arith.constant 0 : index
    %c10 = arith.constant 10 : index
    %c0_43 = arith.constant 0 : index
    %160 = vector.load %arg3[%c0_42, %c10, %c0_43] : memref<1x32x1024xf32, #tpu.memory_space<vmem>>, vector<1x1x1024xf32>
    %161 = vector.shape_cast %160 : vector<1x1x1024xf32> to vector<1x1024xf32>
    %162 = vector.shape_cast %159 : vector<1x1024xf32> to vector<1x1x1024xf32>
    tpu.vector_store %arg3[%c0_42, %c10, %c0_43], %162 {strides = array<i32>} : memref<1x32x1024xf32, #tpu.memory_space<vmem>>, vector<1x1x1024xf32>,
    %c0_44 = arith.constant 0 : index
    %163 = arith.index_cast %36 : i32 to index
    %c0_45 = arith.constant 0 : index
    %164 = vector.load %arg2[%c0_44, %163, %c0_45] : memref<1x8x1024xf32, #tpu.memory_space<vmem>>, vector<1x1x1024xf32>
    %165 = vector.shape_cast %164 : vector<1x1x1024xf32> to vector<1x1024xf32>
    %c0_46 = arith.constant 0 : index
    %c11 = arith.constant 11 : index
    %c0_47 = arith.constant 0 : index
    %166 = vector.load %arg3[%c0_46, %c11, %c0_47] : memref<1x32x1024xf32, #tpu.memory_space<vmem>>, vector<1x1x1024xf32>
    %167 = vector.shape_cast %166 : vector<1x1x1024xf32> to vector<1x1024xf32>
    %168 = vector.shape_cast %165 : vector<1x1024xf32> to vector<1x1x1024xf32>
    tpu.vector_store %arg3[%c0_46, %c11, %c0_47], %168 {strides = array<i32>} : memref<1x32x1024xf32, #tpu.memory_space<vmem>>, vector<1x1x1024xf32>,
    %c0_48 = arith.constant 0 : index
    %169 = arith.index_cast %39 : i32 to index
    %c0_49 = arith.constant 0 : index
    %170 = vector.load %arg2[%c0_48, %169, %c0_49] : memref<1x8x1024xf32, #tpu.memory_space<vmem>>, vector<1x1x1024xf32>
    %171 = vector.shape_cast %170 : vector<1x1x1024xf32> to vector<1x1024xf32>
    %c0_50 = arith.constant 0 : index
    %c12 = arith.constant 12 : index
    %c0_51 = arith.constant 0 : index
    %172 = vector.load %arg3[%c0_50, %c12, %c0_51] : memref<1x32x1024xf32, #tpu.memory_space<vmem>>, vector<1x1x1024xf32>
    %173 = vector.shape_cast %172 : vector<1x1x1024xf32> to vector<1x1024xf32>
    %174 = vector.shape_cast %171 : vector<1x1024xf32> to vector<1x1x1024xf32>
    tpu.vector_store %arg3[%c0_50, %c12, %c0_51], %174 {strides = array<i32>} : memref<1x32x1024xf32, #tpu.memory_space<vmem>>, vector<1x1x1024xf32>,
    %c0_52 = arith.constant 0 : index
    %175 = arith.index_cast %42 : i32 to index
    %c0_53 = arith.constant 0 : index
    %176 = vector.load %arg2[%c0_52, %175, %c0_53] : memref<1x8x1024xf32, #tpu.memory_space<vmem>>, vector<1x1x1024xf32>
    %177 = vector.shape_cast %176 : vector<1x1x1024xf32> to vector<1x1024xf32>
    %c0_54 = arith.constant 0 : index
    %c13 = arith.constant 13 : index
    %c0_55 = arith.constant 0 : index
    %178 = vector.load %arg3[%c0_54, %c13, %c0_55] : memref<1x32x1024xf32, #tpu.memory_space<vmem>>, vector<1x1x1024xf32>
    %179 = vector.shape_cast %178 : vector<1x1x1024xf32> to vector<1x1024xf32>
    %180 = vector.shape_cast %177 : vector<1x1024xf32> to vector<1x1x1024xf32>
    tpu.vector_store %arg3[%c0_54, %c13, %c0_55], %180 {strides = array<i32>} : memref<1x32x1024xf32, #tpu.memory_space<vmem>>, vector<1x1x1024xf32>,
    %c0_56 = arith.constant 0 : index
    %181 = arith.index_cast %45 : i32 to index
    %c0_57 = arith.constant 0 : index
    %182 = vector.load %arg2[%c0_56, %181, %c0_57] : memref<1x8x1024xf32, #tpu.memory_space<vmem>>, vector<1x1x1024xf32>
    %183 = vector.shape_cast %182 : vector<1x1x1024xf32> to vector<1x1024xf32>
    %c0_58 = arith.constant 0 : index
    %c14 = arith.constant 14 : index
    %c0_59 = arith.constant 0 : index
    %184 = vector.load %arg3[%c0_58, %c14, %c0_59] : memref<1x32x1024xf32, #tpu.memory_space<vmem>>, vector<1x1x1024xf32>
    %185 = vector.shape_cast %184 : vector<1x1x1024xf32> to vector<1x1024xf32>
    %186 = vector.shape_cast %183 : vector<1x1024xf32> to vector<1x1x1024xf32>
    tpu.vector_store %arg3[%c0_58, %c14, %c0_59], %186 {strides = array<i32>} : memref<1x32x1024xf32, #tpu.memory_space<vmem>>, vector<1x1x1024xf32>,
    %c0_60 = arith.constant 0 : index
    %187 = arith.index_cast %48 : i32 to index
    %c0_61 = arith.constant 0 : index
    %188 = vector.load %arg2[%c0_60, %187, %c0_61] : memref<1x8x1024xf32, #tpu.memory_space<vmem>>, vector<1x1x1024xf32>
    %189 = vector.shape_cast %188 : vector<1x1x1024xf32> to vector<1x1024xf32>
    %c0_62 = arith.constant 0 : index
    %c15 = arith.constant 15 : index
    %c0_63 = arith.constant 0 : index
    %190 = vector.load %arg3[%c0_62, %c15, %c0_63] : memref<1x32x1024xf32, #tpu.memory_space<vmem>>, vector<1x1x1024xf32>
    %191 = vector.shape_cast %190 : vector<1x1x1024xf32> to vector<1x1024xf32>
    %192 = vector.shape_cast %189 : vector<1x1024xf32> to vector<1x1x1024xf32>
    tpu.vector_store %arg3[%c0_62, %c15, %c0_63], %192 {strides = array<i32>} : memref<1x32x1024xf32, #tpu.memory_space<vmem>>, vector<1x1x1024xf32>,
    %c0_64 = arith.constant 0 : index
    %193 = arith.index_cast %51 : i32 to index
    %c0_65 = arith.constant 0 : index
    %194 = vector.load %arg2[%c0_64, %193, %c0_65] : memref<1x8x1024xf32, #tpu.memory_space<vmem>>, vector<1x1x1024xf32>
    %195 = vector.shape_cast %194 : vector<1x1x1024xf32> to vector<1x1024xf32>
    %c0_66 = arith.constant 0 : index
    %c16 = arith.constant 16 : index
    %c0_67 = arith.constant 0 : index
    %196 = vector.load %arg3[%c0_66, %c16, %c0_67] : memref<1x32x1024xf32, #tpu.memory_space<vmem>>, vector<1x1x1024xf32>
    %197 = vector.shape_cast %196 : vector<1x1x1024xf32> to vector<1x1024xf32>
    %198 = vector.shape_cast %195 : vector<1x1024xf32> to vector<1x1x1024xf32>
    tpu.vector_store %arg3[%c0_66, %c16, %c0_67], %198 {strides = array<i32>} : memref<1x32x1024xf32, #tpu.memory_space<vmem>>, vector<1x1x1024xf32>,
    %c0_68 = arith.constant 0 : index
    %199 = arith.index_cast %54 : i32 to index
    %c0_69 = arith.constant 0 : index
    %200 = vector.load %arg2[%c0_68, %199, %c0_69] : memref<1x8x1024xf32, #tpu.memory_space<vmem>>, vector<1x1x1024xf32>
    %201 = vector.shape_cast %200 : vector<1x1x1024xf32> to vector<1x1024xf32>
    %c0_70 = arith.constant 0 : index
    %c17 = arith.constant 17 : index
    %c0_71 = arith.constant 0 : index
    %202 = vector.load %arg3[%c0_70, %c17, %c0_71] : memref<1x32x1024xf32, #tpu.memory_space<vmem>>, vector<1x1x1024xf32>
    %203 = vector.shape_cast %202 : vector<1x1x1024xf32> to vector<1x1024xf32>
    %204 = vector.shape_cast %201 : vector<1x1024xf32> to vector<1x1x1024xf32>
    tpu.vector_store %arg3[%c0_70, %c17, %c0_71], %204 {strides = array<i32>} : memref<1x32x1024xf32, #tpu.memory_space<vmem>>, vector<1x1x1024xf32>,
    %c0_72 = arith.constant 0 : index
    %205 = arith.index_cast %57 : i32 to index
    %c0_73 = arith.constant 0 : index
    %206 = vector.load %arg2[%c0_72, %205, %c0_73] : memref<1x8x1024xf32, #tpu.memory_space<vmem>>, vector<1x1x1024xf32>
    %207 = vector.shape_cast %206 : vector<1x1x1024xf32> to vector<1x1024xf32>
    %c0_74 = arith.constant 0 : index
    %c18 = arith.constant 18 : index
    %c0_75 = arith.constant 0 : index
    %208 = vector.load %arg3[%c0_74, %c18, %c0_75] : memref<1x32x1024xf32, #tpu.memory_space<vmem>>, vector<1x1x1024xf32>
    %209 = vector.shape_cast %208 : vector<1x1x1024xf32> to vector<1x1024xf32>
    %210 = vector.shape_cast %207 : vector<1x1024xf32> to vector<1x1x1024xf32>
    tpu.vector_store %arg3[%c0_74, %c18, %c0_75], %210 {strides = array<i32>} : memref<1x32x1024xf32, #tpu.memory_space<vmem>>, vector<1x1x1024xf32>,
    %c0_76 = arith.constant 0 : index
    %211 = arith.index_cast %60 : i32 to index
    %c0_77 = arith.constant 0 : index
    %212 = vector.load %arg2[%c0_76, %211, %c0_77] : memref<1x8x1024xf32, #tpu.memory_space<vmem>>, vector<1x1x1024xf32>
    %213 = vector.shape_cast %212 : vector<1x1x1024xf32> to vector<1x1024xf32>
    %c0_78 = arith.constant 0 : index
    %c19 = arith.constant 19 : index
    %c0_79 = arith.constant 0 : index
    %214 = vector.load %arg3[%c0_78, %c19, %c0_79] : memref<1x32x1024xf32, #tpu.memory_space<vmem>>, vector<1x1x1024xf32>
    %215 = vector.shape_cast %214 : vector<1x1x1024xf32> to vector<1x1024xf32>
    %216 = vector.shape_cast %213 : vector<1x1024xf32> to vector<1x1x1024xf32>
    tpu.vector_store %arg3[%c0_78, %c19, %c0_79], %216 {strides = array<i32>} : memref<1x32x1024xf32, #tpu.memory_space<vmem>>, vector<1x1x1024xf32>,
    %c0_80 = arith.constant 0 : index
    %217 = arith.index_cast %63 : i32 to index
    %c0_81 = arith.constant 0 : index
    %218 = vector.load %arg2[%c0_80, %217, %c0_81] : memref<1x8x1024xf32, #tpu.memory_space<vmem>>, vector<1x1x1024xf32>
    %219 = vector.shape_cast %218 : vector<1x1x1024xf32> to vector<1x1024xf32>
    %c0_82 = arith.constant 0 : index
    %c20 = arith.constant 20 : index
    %c0_83 = arith.constant 0 : index
    %220 = vector.load %arg3[%c0_82, %c20, %c0_83] : memref<1x32x1024xf32, #tpu.memory_space<vmem>>, vector<1x1x1024xf32>
    %221 = vector.shape_cast %220 : vector<1x1x1024xf32> to vector<1x1024xf32>
    %222 = vector.shape_cast %219 : vector<1x1024xf32> to vector<1x1x1024xf32>
    tpu.vector_store %arg3[%c0_82, %c20, %c0_83], %222 {strides = array<i32>} : memref<1x32x1024xf32, #tpu.memory_space<vmem>>, vector<1x1x1024xf32>,
    %c0_84 = arith.constant 0 : index
    %223 = arith.index_cast %66 : i32 to index
    %c0_85 = arith.constant 0 : index
    %224 = vector.load %arg2[%c0_84, %223, %c0_85] : memref<1x8x1024xf32, #tpu.memory_space<vmem>>, vector<1x1x1024xf32>
    %225 = vector.shape_cast %224 : vector<1x1x1024xf32> to vector<1x1024xf32>
    %c0_86 = arith.constant 0 : index
    %c21 = arith.constant 21 : index
    %c0_87 = arith.constant 0 : index
    %226 = vector.load %arg3[%c0_86, %c21, %c0_87] : memref<1x32x1024xf32, #tpu.memory_space<vmem>>, vector<1x1x1024xf32>
    %227 = vector.shape_cast %226 : vector<1x1x1024xf32> to vector<1x1024xf32>
    %228 = vector.shape_cast %225 : vector<1x1024xf32> to vector<1x1x1024xf32>
    tpu.vector_store %arg3[%c0_86, %c21, %c0_87], %228 {strides = array<i32>} : memref<1x32x1024xf32, #tpu.memory_space<vmem>>, vector<1x1x1024xf32>,
    %c0_88 = arith.constant 0 : index
    %229 = arith.index_cast %69 : i32 to index
    %c0_89 = arith.constant 0 : index
    %230 = vector.load %arg2[%c0_88, %229, %c0_89] : memref<1x8x1024xf32, #tpu.memory_space<vmem>>, vector<1x1x1024xf32>
    %231 = vector.shape_cast %230 : vector<1x1x1024xf32> to vector<1x1024xf32>
    %c0_90 = arith.constant 0 : index
    %c22 = arith.constant 22 : index
    %c0_91 = arith.constant 0 : index
    %232 = vector.load %arg3[%c0_90, %c22, %c0_91] : memref<1x32x1024xf32, #tpu.memory_space<vmem>>, vector<1x1x1024xf32>
    %233 = vector.shape_cast %232 : vector<1x1x1024xf32> to vector<1x1024xf32>
    %234 = vector.shape_cast %231 : vector<1x1024xf32> to vector<1x1x1024xf32>
    tpu.vector_store %arg3[%c0_90, %c22, %c0_91], %234 {strides = array<i32>} : memref<1x32x1024xf32, #tpu.memory_space<vmem>>, vector<1x1x1024xf32>,
    %c0_92 = arith.constant 0 : index
    %235 = arith.index_cast %72 : i32 to index
    %c0_93 = arith.constant 0 : index
    %236 = vector.load %arg2[%c0_92, %235, %c0_93] : memref<1x8x1024xf32, #tpu.memory_space<vmem>>, vector<1x1x1024xf32>
    %237 = vector.shape_cast %236 : vector<1x1x1024xf32> to vector<1x1024xf32>
    %c0_94 = arith.constant 0 : index
    %c23 = arith.constant 23 : index
    %c0_95 = arith.constant 0 : index
    %238 = vector.load %arg3[%c0_94, %c23, %c0_95] : memref<1x32x1024xf32, #tpu.memory_space<vmem>>, vector<1x1x1024xf32>
    %239 = vector.shape_cast %238 : vector<1x1x1024xf32> to vector<1x1024xf32>
    %240 = vector.shape_cast %237 : vector<1x1024xf32> to vector<1x1x1024xf32>
    tpu.vector_store %arg3[%c0_94, %c23, %c0_95], %240 {strides = array<i32>} : memref<1x32x1024xf32, #tpu.memory_space<vmem>>, vector<1x1x1024xf32>,
    %c0_96 = arith.constant 0 : index
    %241 = arith.index_cast %75 : i32 to index
    %c0_97 = arith.constant 0 : index
    %242 = vector.load %arg2[%c0_96, %241, %c0_97] : memref<1x8x1024xf32, #tpu.memory_space<vmem>>, vector<1x1x1024xf32>
    %243 = vector.shape_cast %242 : vector<1x1x1024xf32> to vector<1x1024xf32>
    %c0_98 = arith.constant 0 : index
    %c24 = arith.constant 24 : index
    %c0_99 = arith.constant 0 : index
    %244 = vector.load %arg3[%c0_98, %c24, %c0_99] : memref<1x32x1024xf32, #tpu.memory_space<vmem>>, vector<1x1x1024xf32>
    %245 = vector.shape_cast %244 : vector<1x1x1024xf32> to vector<1x1024xf32>
    %246 = vector.shape_cast %243 : vector<1x1024xf32> to vector<1x1x1024xf32>
    tpu.vector_store %arg3[%c0_98, %c24, %c0_99], %246 {strides = array<i32>} : memref<1x32x1024xf32, #tpu.memory_space<vmem>>, vector<1x1x1024xf32>,
    %c0_100 = arith.constant 0 : index
    %247 = arith.index_cast %78 : i32 to index
    %c0_101 = arith.constant 0 : index
    %248 = vector.load %arg2[%c0_100, %247, %c0_101] : memref<1x8x1024xf32, #tpu.memory_space<vmem>>, vector<1x1x1024xf32>
    %249 = vector.shape_cast %248 : vector<1x1x1024xf32> to vector<1x1024xf32>
    %c0_102 = arith.constant 0 : index
    %c25 = arith.constant 25 : index
    %c0_103 = arith.constant 0 : index
    %250 = vector.load %arg3[%c0_102, %c25, %c0_103] : memref<1x32x1024xf32, #tpu.memory_space<vmem>>, vector<1x1x1024xf32>
    %251 = vector.shape_cast %250 : vector<1x1x1024xf32> to vector<1x1024xf32>
    %252 = vector.shape_cast %249 : vector<1x1024xf32> to vector<1x1x1024xf32>
    tpu.vector_store %arg3[%c0_102, %c25, %c0_103], %252 {strides = array<i32>} : memref<1x32x1024xf32, #tpu.memory_space<vmem>>, vector<1x1x1024xf32>,
    %c0_104 = arith.constant 0 : index
    %253 = arith.index_cast %81 : i32 to index
    %c0_105 = arith.constant 0 : index
    %254 = vector.load %arg2[%c0_104, %253, %c0_105] : memref<1x8x1024xf32, #tpu.memory_space<vmem>>, vector<1x1x1024xf32>
    %255 = vector.shape_cast %254 : vector<1x1x1024xf32> to vector<1x1024xf32>
    %c0_106 = arith.constant 0 : index
    %c26 = arith.constant 26 : index
    %c0_107 = arith.constant 0 : index
    %256 = vector.load %arg3[%c0_106, %c26, %c0_107] : memref<1x32x1024xf32, #tpu.memory_space<vmem>>, vector<1x1x1024xf32>
    %257 = vector.shape_cast %256 : vector<1x1x1024xf32> to vector<1x1024xf32>
    %258 = vector.shape_cast %255 : vector<1x1024xf32> to vector<1x1x1024xf32>
    tpu.vector_store %arg3[%c0_106, %c26, %c0_107], %258 {strides = array<i32>} : memref<1x32x1024xf32, #tpu.memory_space<vmem>>, vector<1x1x1024xf32>,
    %c0_108 = arith.constant 0 : index
    %259 = arith.index_cast %84 : i32 to index
    %c0_109 = arith.constant 0 : index
    %260 = vector.load %arg2[%c0_108, %259, %c0_109] : memref<1x8x1024xf32, #tpu.memory_space<vmem>>, vector<1x1x1024xf32>
    %261 = vector.shape_cast %260 : vector<1x1x1024xf32> to vector<1x1024xf32>
    %c0_110 = arith.constant 0 : index
    %c27 = arith.constant 27 : index
    %c0_111 = arith.constant 0 : index
    %262 = vector.load %arg3[%c0_110, %c27, %c0_111] : memref<1x32x1024xf32, #tpu.memory_space<vmem>>, vector<1x1x1024xf32>
    %263 = vector.shape_cast %262 : vector<1x1x1024xf32> to vector<1x1024xf32>
    %264 = vector.shape_cast %261 : vector<1x1024xf32> to vector<1x1x1024xf32>
    tpu.vector_store %arg3[%c0_110, %c27, %c0_111], %264 {strides = array<i32>} : memref<1x32x1024xf32, #tpu.memory_space<vmem>>, vector<1x1x1024xf32>,
    %c0_112 = arith.constant 0 : index
    %265 = arith.index_cast %87 : i32 to index
    %c0_113 = arith.constant 0 : index
    %266 = vector.load %arg2[%c0_112, %265, %c0_113] : memref<1x8x1024xf32, #tpu.memory_space<vmem>>, vector<1x1x1024xf32>
    %267 = vector.shape_cast %266 : vector<1x1x1024xf32> to vector<1x1024xf32>
    %c0_114 = arith.constant 0 : index
    %c28 = arith.constant 28 : index
    %c0_115 = arith.constant 0 : index
    %268 = vector.load %arg3[%c0_114, %c28, %c0_115] : memref<1x32x1024xf32, #tpu.memory_space<vmem>>, vector<1x1x1024xf32>
    %269 = vector.shape_cast %268 : vector<1x1x1024xf32> to vector<1x1024xf32>
    %270 = vector.shape_cast %267 : vector<1x1024xf32> to vector<1x1x1024xf32>
    tpu.vector_store %arg3[%c0_114, %c28, %c0_115], %270 {strides = array<i32>} : memref<1x32x1024xf32, #tpu.memory_space<vmem>>, vector<1x1x1024xf32>,
    %c0_116 = arith.constant 0 : index
    %271 = arith.index_cast %90 : i32 to index
    %c0_117 = arith.constant 0 : index
    %272 = vector.load %arg2[%c0_116, %271, %c0_117] : memref<1x8x1024xf32, #tpu.memory_space<vmem>>, vector<1x1x1024xf32>
    %273 = vector.shape_cast %272 : vector<1x1x1024xf32> to vector<1x1024xf32>
    %c0_118 = arith.constant 0 : index
    %c29 = arith.constant 29 : index
    %c0_119 = arith.constant 0 : index
    %274 = vector.load %arg3[%c0_118, %c29, %c0_119] : memref<1x32x1024xf32, #tpu.memory_space<vmem>>, vector<1x1x1024xf32>
    %275 = vector.shape_cast %274 : vector<1x1x1024xf32> to vector<1x1024xf32>
    %276 = vector.shape_cast %273 : vector<1x1024xf32> to vector<1x1x1024xf32>
    tpu.vector_store %arg3[%c0_118, %c29, %c0_119], %276 {strides = array<i32>} : memref<1x32x1024xf32, #tpu.memory_space<vmem>>, vector<1x1x1024xf32>,
    %c0_120 = arith.constant 0 : index
    %277 = arith.index_cast %93 : i32 to index
    %c0_121 = arith.constant 0 : index
    %278 = vector.load %arg2[%c0_120, %277, %c0_121] : memref<1x8x1024xf32, #tpu.memory_space<vmem>>, vector<1x1x1024xf32>
    %279 = vector.shape_cast %278 : vector<1x1x1024xf32> to vector<1x1024xf32>
    %c0_122 = arith.constant 0 : index
    %c30 = arith.constant 30 : index
    %c0_123 = arith.constant 0 : index
    %280 = vector.load %arg3[%c0_122, %c30, %c0_123] : memref<1x32x1024xf32, #tpu.memory_space<vmem>>, vector<1x1x1024xf32>
    %281 = vector.shape_cast %280 : vector<1x1x1024xf32> to vector<1x1024xf32>
    %282 = vector.shape_cast %279 : vector<1x1024xf32> to vector<1x1x1024xf32>
    tpu.vector_store %arg3[%c0_122, %c30, %c0_123], %282 {strides = array<i32>} : memref<1x32x1024xf32, #tpu.memory_space<vmem>>, vector<1x1x1024xf32>,
    %c0_124 = arith.constant 0 : index
    %283 = arith.index_cast %96 : i32 to index
    %c0_125 = arith.constant 0 : index
    %284 = vector.load %arg2[%c0_124, %283, %c0_125] : memref<1x8x1024xf32, #tpu.memory_space<vmem>>, vector<1x1x1024xf32>
    %285 = vector.shape_cast %284 : vector<1x1x1024xf32> to vector<1x1024xf32>
    %c0_126 = arith.constant 0 : index
    %c31 = arith.constant 31 : index
    %c0_127 = arith.constant 0 : index
    %286 = vector.load %arg3[%c0_126, %c31, %c0_127] : memref<1x32x1024xf32, #tpu.memory_space<vmem>>, vector<1x1x1024xf32>
    %287 = vector.shape_cast %286 : vector<1x1x1024xf32> to vector<1x1024xf32>
    %288 = vector.shape_cast %285 : vector<1x1024xf32> to vector<1x1x1024xf32>
    tpu.vector_store %arg3[%c0_126, %c31, %c0_127], %288 {strides = array<i32>} : memref<1x32x1024xf32, #tpu.memory_space<vmem>>, vector<1x1x1024xf32>,
    return
  }
  func.func @transform_0(%arg0: i32, %arg1: memref<64xi32, #tpu.memory_space<smem>>) -> (i32, i32, i32) {
    %c0_i32 = arith.constant 0 : i32
    %c0_i32_0 = arith.constant 0 : i32
    %c0_i32_1 = arith.constant 0 : i32
    return %arg0, %c0_i32, %c0_i32_0 : i32, i32, i32
  }
  func.func @transform_1(%arg0: i32, %arg1: memref<64xi32, #tpu.memory_space<smem>>) -> (i32, i32, i32) {
    %c0_i32 = arith.constant 0 : i32
    %c0_i32_0 = arith.constant 0 : i32
    %c0_i32_1 = arith.constant 0 : i32
    return %arg0, %c0_i32, %c0_i32_0 : i32, i32, i32
  }
}

</mosaic_0001>

<bundles_post_ra>
// kernel: tpu_custom_call.1
= control target key start
LH: loop header
LB: loop body
LE: loop exit
PB: predicated region body
PF: predicated region fallthrough
CT: control target
= control target key end

     0   :  { %s1176_s12 = smov [#allocation3]   ;;  %s1513_s0 = inlined_call_operand.hbm [shape: s32[64], index: 0, kind: input, shape index: {}]   ;;  %s1514_s1 = inlined_call_operand.hbm [shape: f32[2,8,1024], index: 1, kind: input, shape index: {}]   ;;  %s1515_s2 = inlined_call_operand.hbm [shape: f32[2,32,1024], index: 2, kind: output, shape index: {}]  }
   0x1   :  { %1517 = sst [smem:[#allocation13_spill]] %s1514_s1  ;;  %s8_s11 = sshll.u32 %s1513_s0, 4  ;;  %s9_s11 = int_to_ptr.hbm [resolvable:$true] %s8_s11 }
   0x2   :  { %11 = dma.hbm_to_smem %s9_s11, 16, %s1176_s12, [#allocation2] }
   0x3   :  { %1150 = dma.done.wait [#allocation2], 16 }
   0x4   :  { %1151 = vsyncadd [#allocation2], 4294967280 }
   0x5   :  { %14 = sfence }
   0x6   :  { %15 = vsyncpa [#allocation5], 0 }
   0x7   :  { %17 = vsyncpa [#allocation5 + $0x1], 0 }
   0x8   :  { %18 = vsyncpa [#allocation6], 0 }
   0x9   :  { %20 = vsyncpa [#allocation6 + $0x1], 0  ;;  %s1197_s13 = smov 0   ;;  %s1199_s14 = smov 0  }
   0xa   :  { %s1201_s15 = smov 0   ;;  %s1203_s16 = smov 0  }
   0xb LB: > { %1518 = sst [smem:[#allocation11_spill]] %s1170_s15  ;;  %s1218_s0 = sadd.s32 4294967295, %s1174_s16   ;;  %s1174_s16 = sphi %s1203_s16, %s1532_s16   ;;  %s1170_s15 = sphi %s1201_s15, %s1529_s15   ;;  %s1166_s14 = sphi %s1199_s14, %s1531_s14   ;;  %s1162_s13 = sphi %s1197_s13, %s1530_s13  }
   0xc   : > { %s840_s17 = sadd.s32 4294967294, %s1174_s16   ;;  %s1222_s18 = sadd.s32 1, %s1174_s16  }
   0xd   : > { %s33_s19 = sadd.s32 1, %s1170_s15  ;;  %s30_s20 = ssub.s32 %s1174_s16, %s1222_s18 }
   0xe   : > { %p40_p0 = scmp.ne.s32.totalorder %s1170_s15, %s1166_s14  ;;  %p31_p1 = scmp.eq.s32.totalorder %s30_s20, 0 }
   0xf   : > { %p41_p2 = scmp.eq.s32.totalorder %s1174_s16, 0  ;;  %p46_p3 = scmp.ne.s32.totalorder %s1166_s14, %s1162_s13 }
  0x10   : > { %p47_p4 = scmp.eq.s32.totalorder %s1218_s0, 0  ;;  %p70_p7 = scmp.eq.s32.totalorder %s1218_s0, 1 }
  0x11   : > { %s1234_s21 = scalar_select %p31_p1, %s1170_s15, %s33_s19  }
  0x12   : > { %p1236_p5 = por %p41_p2, %p40_p0  ;;  %p1240_p6 = por %p47_p4, %p46_p3 }
  0x13   : > { %1519 = sst [smem:[#allocation12_spill]] %s1234_s21  ;;  %p76_p8 = scmp.eq.s32.totalorder %s840_s17, 1 }
  0x14   : > { %p1027_p10 = scmp.lt.s32.totalorder %s1174_s16, 2  ;;  %p1247_p11 = por %p70_p7, %p40_p0 }
  0x15   : > { %p1251_p12 = por %p76_p8, %p46_p3  ;;  %s96_s26 = sand.u32 1, %s1170_s15  }
  0x16   : > { %s981_s27 = sshll.u32 %s1174_s16, 6  ;;  %s843_s28 = sshll.u32 %s96_s26, 6 }
  0x17   : > { %s1524_s1 = sld [smem:[#allocation13_spill]]  ;;  %s100_s5 = scalar_lea.vmem [#allocation4], %s843_s28 }
  0x18   : > { %s109_s6 = sshll.u32 %s100_s5, 4  ;;  %p1262_p13 = pnand %p1027_p10, %p1236_p5  ;;  %s110_s6 = int_to_ptr.vmem [resolvable:$true] %s109_s6 }
  0x19   : > { %p846_p0 = scmp.ge.s32.totalorder %s1174_s16, 1  ;;  %p114_p1 = scmp.lt.s32.totalorder %s1174_s16, 3 }
  0x1a   : > { %s97_s8 = scalar_lea.sflag [#allocation5], %s96_s26  ;;  %p1080_p3 = pneg %p1262_p13 }
  0x1d   : > { %s105_s3 = scalar_lea.hbm %s1524_s1, %s981_s27  ;;  %s1083_s17 = scalar_lea.hbm %s1524_s1, 128 }
  0x1e   : > { %s107_s4 = sshll.u32 %s105_s3, 4  ;;  %s108_s4 = int_to_ptr.hbm [resolvable:$true] %s107_s4 }
  0x1f   : > { %s1076_s9 = sshra.s32 %s108_s4, 4  ;;  %s1077_s9 = int_to_ptr.hbm [resolvable:$true] %s1076_s9 }
  0x20   : > { %s1078_s10 = scalar_lea.hbm %s1077_s9, 64  ;;  %p1084_p5 = scmp.lt.s32.totalorder %s1077_s9, %s1524_s1 }
  0x21   : > { %p1079_p2 = scmp.ne.s32.totalorder %s1077_s9, %s1078_s10  ;;  %p1085_p8 = scmp.lt.s32.totalorder %s1083_s17, %s1078_s10 }
  0x23   : > { %p1081_p4 = pnand %p1080_p3, %p1079_p2  ;;  %p1086_p10 = por %p1085_p8, %p1084_p5 }
  0x25   : > { %p1082_p7 = pneg %p1081_p4 }
  0x27   : > { %p1087_p9 = pnand %p1086_p10, %p1082_p7 }
  0x29   : > { %1090 = shalt.err (!%p1087_p9)
}
  0x2a   : > { %1022 = dma.hbm_to_vmem [thread:$0]  (!%p1262_p13), %s108_s4, 1024, %s110_s6, %s97_s8  }
  0x2b   : > { %p115_p2 = pnand %p846_p0, %p114_p1 }
  0x2c   : > { %s1283_s22 = sand.u32 (!%p115_p2), 1, %s1166_s14  }
  0x2d   : > { %118 = sbr.rel (%p115_p2) target bundleno = 198 (0xc6), region = 24  ;;  %s847_s26 = sshll.u32 (!%p115_p2), %s1283_s22, 6 }
  0x2e   : > { %s121_s27 = scalar_lea.sflag (!%p115_p2), [#allocation5], %s1283_s22  ;;  %s1287_s28 = scalar_lea.vmem (!%p115_p2), [#allocation4], %s847_s26 }
  0x32   : > { %1153 = dma.done.wait (%p1240_p6), %s121_s27, 1024  }
  0x33   : > { %1155 = vsyncadd (%p1240_p6), %s121_s27, 4294966272  ;;  %s848_s29 = sshll.u32 %s1283_s22, 8  ;;  %s1295_s30 = sshll.u32 %s1218_s0, 5 }
  0x34   : > { %s145_s3 = sld [smem:[#allocation3 + %s1295_s30]]  ;;  %s146_s4 = sadd.s32 1, %s1295_s30 }
  0x35   : > { %s148_s5 = sadd.s32 2, %s1295_s30  ;;  %s147_s6 = sld [smem:[#allocation3 + %s146_s4]] }
  0x36   : > { %s150_s7 = sadd.s32 3, %s1295_s30  ;;  %s149_s23 = sld [smem:[#allocation3 + %s148_s5]] }
  0x37   : > { %s152_s8 = sadd.s32 4, %s1295_s30  ;;  %s1302_s9 = sld [smem:[#allocation3 + %s150_s7]] }
  0x38   : > { %s154_s10 = sadd.s32 5, %s1295_s30  ;;  %s1305_s11 = sld [smem:[#allocation3 + %s152_s8]] }
  0x39   : > { %s1308_s26 = sld [smem:[#allocation3 + %s154_s10]]  ;;  %s1311_s15 = scalar_lea.vmem [#allocation7], %s848_s29 }
  0x3a   : > { %s208_s17 = sshra.s32 %s145_s3, 3  ;;  %s211_s19 = sand.u32 7, %s145_s3 }
  0x3b   : > { %s982_s20 = sshll.u32 %s208_s17, 6  ;;  %s221_s1 = sshra.s32 %s147_s6, 3 }
  0x3c   : > { %s214_s27 = sadd.s32 %s982_s20, %s211_s19  ;;  %s224_s4 = sand.u32 7, %s147_s6 }
  0x3d   : > { %s215_s21 = scalar_lea.vmem %s1287_s28, %s214_s27 [#allocation4]  ;;  %s983_s5 = sshll.u32 %s221_s1, 6 }
  0x3e   : > { %v216_v0 = vld [vmem:[%s215_s21] ss:$8 sm:$0xf]  ;;  %s235_s7 = sshra.s32 %s149_s23, 3  ;;  %s227_s8 = sadd.s32 %s983_s5, %s224_s4 }
  0x3f   : > { %v217_v1 = vld [vmem:[%s215_s21] ss:$8 sm:$0xf0]  ;;  %s238_s12 = sand.u32 7, %s149_s23  ;;  %s228_s3 = scalar_lea.vmem %s1287_s28, %s227_s8 [#allocation4] }
  0x40   : > { %v218_v2 = vor.u32 %v217_v1, %v216_v0  ;;  %s984_s10 = sshll.u32 %s235_s7, 6  ;;  %v229_v3 = vld [vmem:[%s228_s3] ss:$8 sm:$0xf]  ;;  %s249_s6 = sshra.s32 %s1302_s9, 3 }
  0x41   : > { %s241_s21 = sadd.s32 %s984_s10, %s238_s12  ;;  %v230_v4 = vld [vmem:[%s228_s3] ss:$8 sm:$0xf0]  ;;  %s252_s23 = sand.u32 7, %s1302_s9 }
  0x42   : > { %219 = vst [vmem:[%s1311_s15] ss:$8 sm:$0xf] %v218_v2  ;;  %s242_s1 = scalar_lea.vmem %s1287_s28, %s241_s21 [#allocation4]  ;;  %v231_v5 = vor.u32 %v230_v4, %v229_v3  ;;  %s985_s29 = sshll.u32 %s249_s6, 6 }
  0x43   : > { %220 = vst [vmem:[%s1311_s15] ss:$8 sm:$0xf0] %v218_v2  ;;  %v243_v6 = vld [vmem:[%s242_s1] ss:$8 sm:$0xf]  ;;  %s263_s17 = sshra.s32 %s1305_s11, 3  ;;  %s255_s19 = sadd.s32 %s985_s29, %s252_s23 }
  0x44   : > { %v244_v7 = vld [vmem:[%s242_s1] ss:$8 sm:$0xf0]  ;;  %854 = vst [vmem:[%s1311_s15 + $0x1] ss:$8 sm:$0xf] %v231_v5  ;;  %s256_s12 = scalar_lea.vmem %s1287_s28, %s255_s19 [#allocation4] }
  0x45   : > { %v245_v8 = vor.u32 %v244_v7, %v243_v6  ;;  %s266_s20 = sand.u32 7, %s1305_s11  ;;  %855 = vst [vmem:[%s1311_s15 + $0x1] ss:$8 sm:$0xf0] %v231_v5  ;;  %s986_s27 = sshll.u32 %s263_s17, 6 }
  0x46   : > { %v257_v9 = vld [vmem:[%s256_s12] ss:$8 sm:$0xf]  ;;  %s269_s9 = sadd.s32 %s986_s27, %s266_s20  ;;  %s277_s11 = sshra.s32 %s1308_s26, 3 }
  0x47   : > { %858 = vst [vmem:[%s1311_s15 + $0x2] ss:$8 sm:$0xf] %v245_v8  ;;  %v258_v10 = vld [vmem:[%s256_s12] ss:$8 sm:$0xf0]  ;;  %s270_s4 = scalar_lea.vmem %s1287_s28, %s269_s9 [#allocation4] }
  0x48   : > { %859 = vst [vmem:[%s1311_s15 + $0x2] ss:$8 sm:$0xf0] %v245_v8  ;;  %v259_v11 = vor.u32 %v258_v10, %v257_v9  ;;  %v271_v12 = vld [vmem:[%s270_s4] ss:$8 sm:$0xf] }
  0x49   : > { %v272_v13 = vld [vmem:[%s270_s4] ss:$8 sm:$0xf0]  ;;  %s280_s5 = sand.u32 7, %s1308_s26  ;;  %s987_s7 = sshll.u32 %s277_s11, 6 }
  0x4a   : > { %v273_v14 = vor.u32 %v272_v13, %v271_v12  ;;  %862 = vst [vmem:[%s1311_s15 + $0x3] ss:$8 sm:$0xf] %v259_v11  ;;  %s1526_s8 = sadd.s32 6, %s1295_s30  ;;  %s283_s10 = sadd.s32 %s987_s7, %s280_s5 }
  0x4b   : > { %s157_s3 = sld [smem:[#allocation3 + %s1526_s8]]  ;;  %863 = vst [vmem:[%s1311_s15 + $0x3] ss:$8 sm:$0xf0] %v259_v11  ;;  %s158_s21 = sadd.s32 7, %s1295_s30 }
  0x4c   : > { %866 = vst [vmem:[%s1311_s15 + $0x4] ss:$8 sm:$0xf] %v273_v14  ;;  %s284_s6 = scalar_lea.vmem %s1287_s28, %s283_s10 [#allocation4]  ;;  %s159_s1 = sld [smem:[#allocation3 + %s158_s21]] }
  0x4d   : > { %867 = vst [vmem:[%s1311_s15 + $0x4] ss:$8 sm:$0xf0] %v273_v14  ;;  %v285_v15 = vld [vmem:[%s284_s6] ss:$8 sm:$0xf] }
  0x4e   : > { %v286_v16 = vld [vmem:[%s284_s6] ss:$8 sm:$0xf0]  ;;  %s160_s23 = sadd.s32 8, %s1295_s30  ;;  %s162_s29 = sadd.s32 9, %s1295_s30 }
  0x4f   : > { %v287_v17 = vor.u32 %v286_v16, %v285_v15  ;;  %s161_s26 = sld [smem:[#allocation3 + %s160_s23]]  ;;  %s164_s17 = sadd.s32 10, %s1295_s30 }
  0x50   : > { %s1341_s27 = sld [smem:[#allocation3 + %s162_s29]] }
  0x51   : > { %s291_s19 = sshra.s32 %s157_s3, 3  ;;  %s294_s20 = sand.u32 7, %s157_s3  ;;  %870 = vst [vmem:[%s1311_s15 + $0x5] ss:$8 sm:$0xf] %v287_v17 }
  0x52   : > { %s988_s12 = sshll.u32 %s291_s19, 6  ;;  %871 = vst [vmem:[%s1311_s15 + $0x5] ss:$8 sm:$0xf0] %v287_v17  ;;  %s305_s4 = sshra.s32 %s159_s1, 3 }
  0x53   : > { %s297_s9 = sadd.s32 %s988_s12, %s294_s20  ;;  %s308_s5 = sand.u32 7, %s159_s1 }
  0x54   : > { %s298_s11 = scalar_lea.vmem %s1287_s28, %s297_s9 [#allocation4]  ;;  %s989_s7 = sshll.u32 %s305_s4, 6 }
  0x55   : > { %v299_v18 = vld [vmem:[%s298_s11] ss:$8 sm:$0xf]  ;;  %s319_s8 = sshra.s32 %s161_s26, 3  ;;  %s311_s3 = sadd.s32 %s989_s7, %s308_s5 }
  0x56   : > { %v300_v19 = vld [vmem:[%s298_s11] ss:$8 sm:$0xf0]  ;;  %s322_s10 = sand.u32 7, %s161_s26  ;;  %s312_s21 = scalar_lea.vmem %s1287_s28, %s311_s3 [#allocation4] }
  0x57   : > { %v301_v20 = vor.u32 %v300_v19, %v299_v18  ;;  %s990_s6 = sshll.u32 %s319_s8, 6  ;;  %v313_v21 = vld [vmem:[%s312_s21] ss:$8 sm:$0xf]  ;;  %s333_s29 = sshra.s32 %s1341_s27, 3 }
  0x58   : > { %s325_s1 = sadd.s32 %s990_s6, %s322_s10  ;;  %v314_v22 = vld [vmem:[%s312_s21] ss:$8 sm:$0xf0]  ;;  %s336_s26 = sand.u32 7, %s1341_s27 }
  0x59   : > { %874 = vst [vmem:[%s1311_s15 + $0x6] ss:$8 sm:$0xf] %v301_v20  ;;  %s326_s23 = scalar_lea.vmem %s1287_s28, %s325_s1 [#allocation4]  ;;  %v315_v23 = vor.u32 %v314_v22, %v313_v21  ;;  %s991_s19 = sshll.u32 %s333_s29, 6 }
  0x5a   : > { %875 = vst [vmem:[%s1311_s15 + $0x6] ss:$8 sm:$0xf0] %v301_v20  ;;  %v327_v24 = vld [vmem:[%s326_s23] ss:$8 sm:$0xf]  ;;  %s339_s20 = sadd.s32 %s991_s19, %s336_s26 }
  0x5b   : > { %v328_v25 = vld [vmem:[%s326_s23] ss:$8 sm:$0xf0]  ;;  %878 = vst [vmem:[%s1311_s15 + $0x7] ss:$8 sm:$0xf] %v315_v23  ;;  %s340_s9 = scalar_lea.vmem %s1287_s28, %s339_s20 [#allocation4] }
  0x5c   : > { %v329_v26 = vor.u32 %v328_v25, %v327_v24  ;;  %s165_s12 = sld [smem:[#allocation3 + %s164_s17]]  ;;  %879 = vst [vmem:[%s1311_s15 + $0x7] ss:$8 sm:$0xf0] %v315_v23  ;;  %s166_s4 = sadd.s32 11, %s1295_s30 }
  0x5d   : > { %v341_v27 = vld [vmem:[%s340_s9] ss:$8 sm:$0xf]  ;;  %s167_s11 = sld [smem:[#allocation3 + %s166_s4]]  ;;  %s168_s27 = sadd.s32 12, %s1295_s30 }
  0x5e   : > { %882 = vst [vmem:[%s1311_s15 + $0x40] ss:$8 sm:$0xf] %v329_v26  ;;  %v342_v28 = vld [vmem:[%s340_s9] ss:$8 sm:$0xf0] }
  0x5f   : > { %883 = vst [vmem:[%s1311_s15 + $0x40] ss:$8 sm:$0xf0] %v329_v26  ;;  %v343_v29 = vor.u32 %v342_v28, %v341_v27  ;;  %s169_s5 = sld [smem:[#allocation3 + %s168_s27]]  ;;  %s170_s7 = sadd.s32 13, %s1295_s30 }
  0x60   : > { %s1363_s10 = sld [smem:[#allocation3 + %s170_s7]]  ;;  %s172_s6 = sadd.s32 14, %s1295_s30 }
  0x61   : > { %886 = vst [vmem:[%s1311_s15 + $0x41] ss:$8 sm:$0xf] %v343_v29  ;;  %s1367_s23 = sld [smem:[#allocation3 + %s172_s6]] }
  0x62   : > { %s347_s8 = sshra.s32 %s165_s12, 3  ;;  %s350_s3 = sand.u32 7, %s165_s12  ;;  %887 = vst [vmem:[%s1311_s15 + $0x41] ss:$8 sm:$0xf0] %v343_v29 }
  0x63   : > { %s992_s17 = sshll.u32 %s347_s8, 6  ;;  %s361_s29 = sshra.s32 %s167_s11, 3 }
  0x64   : > { %s353_s21 = sadd.s32 %s992_s17, %s350_s3  ;;  %s364_s26 = sand.u32 7, %s167_s11 }
  0x65   : > { %s354_s1 = scalar_lea.vmem %s1287_s28, %s353_s21 [#allocation4]  ;;  %s993_s19 = sshll.u32 %s361_s29, 6 }
  0x66   : > { %v355_v30 = vld [vmem:[%s354_s1] ss:$8 sm:$0xf]  ;;  %s375_s20 = sshra.s32 %s169_s5, 3  ;;  %s367_s12 = sadd.s32 %s993_s19, %s364_s26 }
  0x67   : > { %v356_v31 = vld [vmem:[%s354_s1] ss:$8 sm:$0xf0]  ;;  %s378_s9 = sand.u32 7, %s169_s5  ;;  %s368_s4 = scalar_lea.vmem %s1287_s28, %s367_s12 [#allocation4] }
  0x68   : > { %v357_v32 = vor.u32 %v356_v31, %v355_v30  ;;  %s994_s27 = sshll.u32 %s375_s20, 6  ;;  %v369_v33 = vld [vmem:[%s368_s4] ss:$8 sm:$0xf]  ;;  %s389_s8 = sshra.s32 %s1363_s10, 3 }
  0x69   : > { %v370_v34 = vld [vmem:[%s368_s4] ss:$8 sm:$0xf0]  ;;  %s381_s7 = sadd.s32 %s994_s27, %s378_s9  ;;  %s392_s5 = sand.u32 7, %s1363_s10 }
  0x6a   : > { %890 = vst [vmem:[%s1311_s15 + $0x42] ss:$8 sm:$0xf] %v357_v32  ;;  %v371_v35 = vor.u32 %v370_v34, %v369_v33  ;;  %s382_s11 = scalar_lea.vmem %s1287_s28, %s381_s7 [#allocation4]  ;;  %s995_s3 = sshll.u32 %s389_s8, 6 }
  0x6b   : > { %891 = vst [vmem:[%s1311_s15 + $0x42] ss:$8 sm:$0xf0] %v357_v32  ;;  %v383_v36 = vld [vmem:[%s382_s11] ss:$8 sm:$0xf]  ;;  %s395_s17 = sadd.s32 %s995_s3, %s392_s5 }
  0x6c   : > { %v384_v37 = vld [vmem:[%s382_s11] ss:$8 sm:$0xf0]  ;;  %894 = vst [vmem:[%s1311_s15 + $0x43] ss:$8 sm:$0xf] %v371_v35  ;;  %s396_s6 = scalar_lea.vmem %s1287_s28, %s395_s17 [#allocation4] }
  0x6d   : > { %v385_v38 = vor.u32 %v384_v37, %v383_v36  ;;  %895 = vst [vmem:[%s1311_s15 + $0x43] ss:$8 sm:$0xf0] %v371_v35  ;;  %s403_s21 = sshra.s32 %s1367_s23, 3  ;;  %s406_s1 = sand.u32 7, %s1367_s23 }
  0x6e   : > { %v397_v39 = vld [vmem:[%s396_s6] ss:$8 sm:$0xf]  ;;  %s996_s29 = sshll.u32 %s403_s21, 6  ;;  %s174_s26 = sadd.s32 15, %s1295_s30 }
  0x6f   : > { %898 = vst [vmem:[%s1311_s15 + $0x44] ss:$8 sm:$0xf] %v385_v38  ;;  %v398_v40 = vld [vmem:[%s396_s6] ss:$8 sm:$0xf0]  ;;  %s409_s10 = sadd.s32 %s996_s29, %s406_s1 }
  0x70   : > { %899 = vst [vmem:[%s1311_s15 + $0x44] ss:$8 sm:$0xf0] %v385_v38  ;;  %v399_v41 = vor.u32 %v398_v40, %v397_v39  ;;  %s175_s19 = sld [smem:[#allocation3 + %s174_s26]]  ;;  %s410_s20 = scalar_lea.vmem %s1287_s28, %s409_s10 [#allocation4] }
  0x71   : > { %s176_s12 = sadd.s32 16, %s1295_s30  ;;  %v411_v42 = vld [vmem:[%s410_s20] ss:$8 sm:$0xf]  ;;  %s178_s9 = sadd.s32 17, %s1295_s30 }
  0x72   : > { %902 = vst [vmem:[%s1311_s15 + $0x45] ss:$8 sm:$0xf] %v399_v41  ;;  %v412_v43 = vld [vmem:[%s410_s20] ss:$8 sm:$0xf0] }
  0x73   : > { %903 = vst [vmem:[%s1311_s15 + $0x45] ss:$8 sm:$0xf0] %v399_v41  ;;  %v413_v44 = vor.u32 %v412_v43, %v411_v42  ;;  %s177_s23 = sld [smem:[#allocation3 + %s176_s12]]  ;;  %s180_s27 = sadd.s32 18, %s1295_s30 }
  0x74   : > { %s179_s4 = sld [smem:[#allocation3 + %s178_s9]]  ;;  %s182_s17 = sadd.s32 19, %s1295_s30 }
  0x75   : > { %906 = vst [vmem:[%s1311_s15 + $0x46] ss:$8 sm:$0xf] %v413_v44  ;;  %s1391_s5 = sld [smem:[#allocation3 + %s180_s27]] }
  0x76   : > { %s417_s7 = sshra.s32 %s175_s19, 3  ;;  %s420_s11 = sand.u32 7, %s175_s19  ;;  %907 = vst [vmem:[%s1311_s15 + $0x46] ss:$8 sm:$0xf0] %v413_v44 }
  0x77   : > { %s997_s8 = sshll.u32 %s417_s7, 6  ;;  %s1395_s6 = sld [smem:[#allocation3 + %s182_s17]] }
  0x78   : > { %s423_s3 = sadd.s32 %s997_s8, %s420_s11 }
  0x79   : > { %s424_s21 = scalar_lea.vmem %s1287_s28, %s423_s3 [#allocation4]  ;;  %s431_s1 = sshra.s32 %s177_s23, 3 }
  0x7a   : > { %v425_v45 = vld [vmem:[%s424_s21] ss:$8 sm:$0xf]  ;;  %s434_s29 = sand.u32 7, %s177_s23  ;;  %s998_s26 = sshll.u32 %s431_s1, 6 }
  0x7b   : > { %v426_v46 = vld [vmem:[%s424_s21] ss:$8 sm:$0xf0]  ;;  %s445_s10 = sshra.s32 %s179_s4, 3  ;;  %s437_s19 = sadd.s32 %s998_s26, %s434_s29 }
  0x7c   : > { %v427_v47 = vor.u32 %v426_v46, %v425_v45  ;;  %s448_s20 = sand.u32 7, %s179_s4  ;;  %s438_s12 = scalar_lea.vmem %s1287_s28, %s437_s19 [#allocation4] }
  0x7d   : > { %s999_s9 = sshll.u32 %s445_s10, 6  ;;  %v439_v48 = vld [vmem:[%s438_s12] ss:$8 sm:$0xf]  ;;  %s459_s7 = sshra.s32 %s1391_s5, 3 }
  0x7e   : > { %910 = vst [vmem:[%s1311_s15 + $0x47] ss:$8 sm:$0xf] %v427_v47  ;;  %v440_v49 = vld [vmem:[%s438_s12] ss:$8 sm:$0xf0]  ;;  %s451_s27 = sadd.s32 %s999_s9, %s448_s20 }
  0x7f   : > { %911 = vst [vmem:[%s1311_s15 + $0x47] ss:$8 sm:$0xf0] %v427_v47  ;;  %v441_v50 = vor.u32 %v440_v49, %v439_v48  ;;  %s452_s23 = scalar_lea.vmem %s1287_s28, %s451_s27 [#allocation4]  ;;  %s462_s4 = sand.u32 7, %s1391_s5 }
  0x80   : > { %v453_v51 = vld [vmem:[%s452_s23] ss:$8 sm:$0xf]  ;;  %s1000_s11 = sshll.u32 %s459_s7, 6  ;;  %s473_s3 = sshra.s32 %s1395_s6, 3 }
  0x81   : > { %v454_v52 = vld [vmem:[%s452_s23] ss:$8 sm:$0xf0]  ;;  %914 = vst [vmem:[%s1311_s15 + $0x80] ss:$8 sm:$0xf] %v441_v50  ;;  %s465_s8 = sadd.s32 %s1000_s11, %s462_s4 }
  0x82   : > { %v455_v53 = vor.u32 %v454_v52, %v453_v51  ;;  %915 = vst [vmem:[%s1311_s15 + $0x80] ss:$8 sm:$0xf0] %v441_v50  ;;  %s466_s17 = scalar_lea.vmem %s1287_s28, %s465_s8 [#allocation4]  ;;  %s476_s21 = sand.u32 7, %s1395_s6 }
  0x83   : > { %v467_v54 = vld [vmem:[%s466_s17] ss:$8 sm:$0xf]  ;;  %s1001_s1 = sshll.u32 %s473_s3, 6  ;;  %s184_s29 = sadd.s32 20, %s1295_s30 }
  0x84   : > { %918 = vst [vmem:[%s1311_s15 + $0x81] ss:$8 sm:$0xf] %v455_v53  ;;  %v468_v55 = vld [vmem:[%s466_s17] ss:$8 sm:$0xf0]  ;;  %s479_s5 = sadd.s32 %s1001_s1, %s476_s21 }
  0x85   : > { %919 = vst [vmem:[%s1311_s15 + $0x81] ss:$8 sm:$0xf0] %v455_v53  ;;  %v469_v56 = vor.u32 %v468_v55, %v467_v54  ;;  %s185_s26 = sld [smem:[#allocation3 + %s184_s29]]  ;;  %s480_s10 = scalar_lea.vmem %s1287_s28, %s479_s5 [#allocation4] }
  0x86   : > { %s186_s19 = sadd.s32 21, %s1295_s30  ;;  %v481_v57 = vld [vmem:[%s480_s10] ss:$8 sm:$0xf]  ;;  %s188_s20 = sadd.s32 22, %s1295_s30 }
  0x87   : > { %922 = vst [vmem:[%s1311_s15 + $0x82] ss:$8 sm:$0xf] %v469_v56  ;;  %v482_v58 = vld [vmem:[%s480_s10] ss:$8 sm:$0xf0] }
  0x88   : > { %923 = vst [vmem:[%s1311_s15 + $0x82] ss:$8 sm:$0xf0] %v469_v56  ;;  %v483_v59 = vor.u32 %v482_v58, %v481_v57  ;;  %s187_s6 = sld [smem:[#allocation3 + %s186_s19]]  ;;  %s190_s9 = sadd.s32 23, %s1295_s30 }
  0x89   : > { %s189_s12 = sld [smem:[#allocation3 + %s188_s20]]  ;;  %s192_s8 = sadd.s32 24, %s1295_s30 }
  0x8a   : > { %926 = vst [vmem:[%s1311_s15 + $0x83] ss:$8 sm:$0xf] %v483_v59  ;;  %s1419_s4 = sld [smem:[#allocation3 + %s190_s9]] }
  0x8b   : > { %s487_s27 = sshra.s32 %s185_s26, 3  ;;  %s490_s23 = sand.u32 7, %s185_s26  ;;  %927 = vst [vmem:[%s1311_s15 + $0x83] ss:$8 sm:$0xf0] %v483_v59 }
  0x8c   : > { %s1002_s7 = sshll.u32 %s487_s27, 6  ;;  %s1423_s17 = sld [smem:[#allocation3 + %s192_s8]] }
  0x8d   : > { %s493_s11 = sadd.s32 %s1002_s7, %s490_s23 }
  0x8e   : > { %s494_s3 = scalar_lea.vmem %s1287_s28, %s493_s11 [#allocation4]  ;;  %s501_s21 = sshra.s32 %s187_s6, 3 }
  0x8f   : > { %v495_v60 = vld [vmem:[%s494_s3] ss:$8 sm:$0xf]  ;;  %s504_s1 = sand.u32 7, %s187_s6  ;;  %s1003_s29 = sshll.u32 %s501_s21, 6 }
  0x90   : > { %v496_v61 = vld [vmem:[%s494_s3] ss:$8 sm:$0xf0]  ;;  %s515_s5 = sshra.s32 %s189_s12, 3  ;;  %s507_s26 = sadd.s32 %s1003_s29, %s504_s1 }
  0x91   : > { %v497_v62 = vor.u32 %v496_v61, %v495_v60  ;;  %s518_s10 = sand.u32 7, %s189_s12  ;;  %s508_s19 = scalar_lea.vmem %s1287_s28, %s507_s26 [#allocation4] }
  0x92   : > { %s1004_s20 = sshll.u32 %s515_s5, 6  ;;  %v509_v63 = vld [vmem:[%s508_s19] ss:$8 sm:$0xf]  ;;  %s529_s27 = sshra.s32 %s1419_s4, 3 }
  0x93   : > { %930 = vst [vmem:[%s1311_s15 + $0x84] ss:$8 sm:$0xf] %v497_v62  ;;  %v510_v0 = vld [vmem:[%s508_s19] ss:$8 sm:$0xf0]  ;;  %s521_s9 = sadd.s32 %s1004_s20, %s518_s10 }
  0x94   : > { %931 = vst [vmem:[%s1311_s15 + $0x84] ss:$8 sm:$0xf0] %v497_v62  ;;  %v511_v1 = vor.u32 %v510_v0, %v509_v63  ;;  %s522_s6 = scalar_lea.vmem %s1287_s28, %s521_s9 [#allocation4]  ;;  %s532_s12 = sand.u32 7, %s1419_s4 }
  0x95   : > { %v523_v2 = vld [vmem:[%s522_s6] ss:$8 sm:$0xf]  ;;  %s1005_s23 = sshll.u32 %s529_s27, 6  ;;  %s543_s11 = sshra.s32 %s1423_s17, 3 }
  0x96   : > { %v524_v3 = vld [vmem:[%s522_s6] ss:$8 sm:$0xf0]  ;;  %934 = vst [vmem:[%s1311_s15 + $0x85] ss:$8 sm:$0xf] %v511_v1  ;;  %s535_s7 = sadd.s32 %s1005_s23, %s532_s12 }
  0x97   : > { %v525_v4 = vor.u32 %v524_v3, %v523_v2  ;;  %935 = vst [vmem:[%s1311_s15 + $0x85] ss:$8 sm:$0xf0] %v511_v1  ;;  %s536_s8 = scalar_lea.vmem %s1287_s28, %s535_s7 [#allocation4]  ;;  %s546_s3 = sand.u32 7, %s1423_s17 }
  0x98   : > { %v537_v5 = vld [vmem:[%s536_s8] ss:$8 sm:$0xf]  ;;  %s1006_s21 = sshll.u32 %s543_s11, 6  ;;  %s194_s1 = sadd.s32 25, %s1295_s30 }
  0x99   : > { %938 = vst [vmem:[%s1311_s15 + $0x86] ss:$8 sm:$0xf] %v525_v4  ;;  %v538_v6 = vld [vmem:[%s536_s8] ss:$8 sm:$0xf0]  ;;  %s549_s4 = sadd.s32 %s1006_s21, %s546_s3 }
  0x9a   : > { %939 = vst [vmem:[%s1311_s15 + $0x86] ss:$8 sm:$0xf0] %v525_v4  ;;  %v539_v7 = vor.u32 %v538_v6, %v537_v5  ;;  %s195_s29 = sld [smem:[#allocation3 + %s194_s1]]  ;;  %s550_s5 = scalar_lea.vmem %s1287_s28, %s549_s4 [#allocation4] }
  0x9b   : > { %s196_s26 = sadd.s32 26, %s1295_s30  ;;  %v551_v8 = vld [vmem:[%s550_s5] ss:$8 sm:$0xf]  ;;  %s198_s10 = sadd.s32 27, %s1295_s30 }
  0x9c   : > { %942 = vst [vmem:[%s1311_s15 + $0x87] ss:$8 sm:$0xf] %v539_v7  ;;  %v552_v9 = vld [vmem:[%s550_s5] ss:$8 sm:$0xf0] }
  0x9d   : > { %943 = vst [vmem:[%s1311_s15 + $0x87] ss:$8 sm:$0xf0] %v539_v7  ;;  %v553_v10 = vor.u32 %v552_v9, %v551_v8  ;;  %s197_s17 = sld [smem:[#allocation3 + %s196_s26]]  ;;  %s200_s20 = sadd.s32 28, %s1295_s30 }
  0x9e   : > { %s199_s19 = sld [smem:[#allocation3 + %s198_s10]]  ;;  %s202_s7 = sadd.s32 29, %s1295_s30 }
  0x9f   : > { %946 = vst [vmem:[%s1311_s15 + $0xc0] ss:$8 sm:$0xf] %v553_v10  ;;  %s1447_s12 = sld [smem:[#allocation3 + %s200_s20]] }
  0xa0   : > { %s557_s9 = sshra.s32 %s195_s29, 3  ;;  %s560_s6 = sand.u32 7, %s195_s29  ;;  %947 = vst [vmem:[%s1311_s15 + $0xc0] ss:$8 sm:$0xf0] %v553_v10 }
  0xa1   : > { %s1007_s27 = sshll.u32 %s557_s9, 6  ;;  %s1451_s8 = sld [smem:[#allocation3 + %s202_s7]] }
  0xa2   : > { %s563_s23 = sadd.s32 %s1007_s27, %s560_s6 }
  0xa3   : > { %s564_s11 = scalar_lea.vmem %s1287_s28, %s563_s23 [#allocation4]  ;;  %s571_s3 = sshra.s32 %s197_s17, 3 }
  0xa4   : > { %v565_v11 = vld [vmem:[%s564_s11] ss:$8 sm:$0xf]  ;;  %s574_s21 = sand.u32 7, %s197_s17  ;;  %s1008_s1 = sshll.u32 %s571_s3, 6 }
  0xa5   : > { %v566_v12 = vld [vmem:[%s564_s11] ss:$8 sm:$0xf0]  ;;  %s585_s4 = sshra.s32 %s199_s19, 3  ;;  %s577_s29 = sadd.s32 %s1008_s1, %s574_s21 }
  0xa6   : > { %v567_v13 = vor.u32 %v566_v12, %v565_v11  ;;  %s588_s5 = sand.u32 7, %s199_s19  ;;  %s578_s26 = scalar_lea.vmem %s1287_s28, %s577_s29 [#allocation4] }
  0xa7   : > { %s1009_s10 = sshll.u32 %s585_s4, 6  ;;  %v579_v14 = vld [vmem:[%s578_s26] ss:$8 sm:$0xf]  ;;  %s599_s9 = sshra.s32 %s1447_s12, 3 }
  0xa8   : > { %950 = vst [vmem:[%s1311_s15 + $0xc1] ss:$8 sm:$0xf] %v567_v13  ;;  %v580_v15 = vld [vmem:[%s578_s26] ss:$8 sm:$0xf0]  ;;  %s591_s20 = sadd.s32 %s1009_s10, %s588_s5 }
  0xa9   : > { %951 = vst [vmem:[%s1311_s15 + $0xc1] ss:$8 sm:$0xf0] %v567_v13  ;;  %v581_v16 = vor.u32 %v580_v15, %v579_v14  ;;  %s592_s17 = scalar_lea.vmem %s1287_s28, %s591_s20 [#allocation4]  ;;  %s602_s19 = sand.u32 7, %s1447_s12 }
  0xaa   : > { %v593_v17 = vld [vmem:[%s592_s17] ss:$8 sm:$0xf]  ;;  %s1010_s6 = sshll.u32 %s599_s9, 6  ;;  %s613_s23 = sshra.s32 %s1451_s8, 3 }
  0xab   : > { %v594_v18 = vld [vmem:[%s592_s17] ss:$8 sm:$0xf0]  ;;  %954 = vst [vmem:[%s1311_s15 + $0xc2] ss:$8 sm:$0xf] %v581_v16  ;;  %s605_s27 = sadd.s32 %s1010_s6, %s602_s19 }
  0xac   : > { %v595_v19 = vor.u32 %v594_v18, %v593_v17  ;;  %955 = vst [vmem:[%s1311_s15 + $0xc2] ss:$8 sm:$0xf0] %v581_v16  ;;  %s606_s7 = scalar_lea.vmem %s1287_s28, %s605_s27 [#allocation4]  ;;  %s616_s11 = sand.u32 7, %s1451_s8 }
  0xad   : > { %v607_v20 = vld [vmem:[%s606_s7] ss:$8 sm:$0xf]  ;;  %s1011_s3 = sshll.u32 %s613_s23, 6  ;;  %s204_s21 = sadd.s32 30, %s1295_s30 }
  0xae   : > { %958 = vst [vmem:[%s1311_s15 + $0xc3] ss:$8 sm:$0xf] %v595_v19  ;;  %v608_v21 = vld [vmem:[%s606_s7] ss:$8 sm:$0xf0]  ;;  %s619_s12 = sadd.s32 %s1011_s3, %s616_s11 }
  0xaf   : > { %959 = vst [vmem:[%s1311_s15 + $0xc3] ss:$8 sm:$0xf0] %v595_v19  ;;  %v609_v22 = vor.u32 %v608_v21, %v607_v20  ;;  %s205_s1 = sld [smem:[#allocation3 + %s204_s21]]  ;;  %s620_s4 = scalar_lea.vmem %s1287_s28, %s619_s12 [#allocation4] }
  0xb0   : > { %s206_s29 = sadd.s32 31, %s1295_s30  ;;  %v621_v23 = vld [vmem:[%s620_s4] ss:$8 sm:$0xf]  ;;  %s1014_s20 = sshll.u32 %s1218_s0, 8 }
  0xb1   : > { %962 = vst [vmem:[%s1311_s15 + $0xc4] ss:$8 sm:$0xf] %v609_v22  ;;  %v622_v24 = vld [vmem:[%s620_s4] ss:$8 sm:$0xf0]  ;;  %s667_s6 = scalar_lea.hbm %s1515_s2, %s1014_s20 }
  0xb2   : > { %963 = vst [vmem:[%s1311_s15 + $0xc4] ss:$8 sm:$0xf0] %v609_v22  ;;  %v623_v25 = vor.u32 %v622_v24, %v621_v23  ;;  %s207_s8 = sld [smem:[#allocation3 + %s206_s29]]  ;;  %s668_s11 = sshll.u32 %s1311_s15, 4  ;;  %s669_s11 = int_to_ptr.vmem [resolvable:$true] %s668_s11 }
  0xb3   : > { %s670_s0 = sshll.u32 %s667_s6, 4  ;;  %s656_s12 = scalar_lea.sflag [#allocation6], %s1283_s22  ;;  %s671_s0 = int_to_ptr.hbm [resolvable:$true] %s670_s0 }
  0xb4   : > { %966 = vst [vmem:[%s1311_s15 + $0xc5] ss:$8 sm:$0xf] %v623_v25 }
  0xb5   : > { %s627_s5 = sshra.s32 %s205_s1, 3  ;;  %s630_s26 = sand.u32 7, %s205_s1  ;;  %967 = vst [vmem:[%s1311_s15 + $0xc5] ss:$8 sm:$0xf0] %v623_v25 }
  0xb6   : > { %s1012_s10 = sshll.u32 %s627_s5, 6  ;;  %s1120_s1 = sshra.s32 %s671_s0, 4  ;;  %s1121_s1 = int_to_ptr.hbm [resolvable:$true] %s1120_s1 }
  0xb7   : > { %s633_s17 = sadd.s32 %s1012_s10, %s630_s26  ;;  %s1122_s4 = scalar_lea.hbm %s1121_s1, 256 }
  0xb8   : > { %s634_s9 = scalar_lea.vmem %s1287_s28, %s633_s17 [#allocation4]  ;;  %s641_s27 = sshra.s32 %s207_s8, 3 }
  0xb9   : > { %v635_v26 = vld [vmem:[%s634_s9] ss:$8 sm:$0xf]  ;;  %s644_s23 = sand.u32 7, %s207_s8  ;;  %s1013_s7 = sshll.u32 %s641_s27, 6 }
  0xba   : > { %v636_v27 = vld [vmem:[%s634_s9] ss:$8 sm:$0xf0]  ;;  %s647_s3 = sadd.s32 %s1013_s7, %s644_s23  ;;  %p1123_p6 = scmp.ne.s32.totalorder %s1121_s1, %s1122_s4 }
  0xbb   : > { %v637_v28 = vor.u32 %v636_v27, %v635_v26  ;;  %s648_s21 = scalar_lea.vmem %s1287_s28, %s647_s3 [#allocation4]  ;;  %s1126_s5 = scalar_lea.hbm %s1515_s2, 512 }
  0xbc   : > { %v649_v29 = vld [vmem:[%s648_s21] ss:$8 sm:$0xf]  ;;  %p1124_p9 = pnand %p1123_p6, %p1247_p11  ;;  %p1127_p0 = scmp.lt.s32.totalorder %s1121_s1, %s1515_s2 }
  0xbd   : > { %970 = vst [vmem:[%s1311_s15 + $0xc6] ss:$8 sm:$0xf] %v637_v28  ;;  %v650_v30 = vld [vmem:[%s648_s21] ss:$8 sm:$0xf0]  ;;  %p1128_p1 = scmp.lt.s32.totalorder %s1126_s5, %s1122_s4 }
  0xbe   : > { %971 = vst [vmem:[%s1311_s15 + $0xc6] ss:$8 sm:$0xf0] %v637_v28  ;;  %v651_v31 = vor.u32 %v650_v30, %v649_v29  ;;  %p1125_p13 = pneg %p1124_p9 }
  0xbf   : > { %p1129_p3 = por %p1128_p1, %p1127_p0 }
  0xc0   : > { %974 = vst [vmem:[%s1311_s15 + $0xc7] ss:$8 sm:$0xf] %v651_v31 }
  0xc1   : > { %975 = vst [vmem:[%s1311_s15 + $0xc7] ss:$8 sm:$0xf0] %v651_v31  ;;  %p1130_p4 = pnand %p1129_p3, %p1125_p13 }
  0xc3   : > { %1133 = shalt.err (!%p1130_p4)
}
  0xc4   : > { %s1177_s15 = smov 1024   ;;  %s1178_s22 = smov 64  }
  0xc5   : > { %1017 = dma.vmem_to_hbm [thread:$0]  (%p1247_p11), %s669_s11, 4096, %s671_s0, %s656_s12, %s1177_s15, %s1177_s15, %s1178_s22  }
  0xc6 PF: > { %s685_s10 = sand.u32 1, %s1162_s13   ;;  %p1527_p7 = scmp.ge.s32.totalorder %s1174_s16, 2 }
  0xc7   : > { %s686_s20 = scalar_lea.sflag [#allocation6], %s685_s10 }
  0xc8   : > { %p1024_p5 = pnand %p1527_p7, %p1251_p12 }
  0xca   : > { %p1025_p8 = pneg %p1024_p5 }
  0xcc   : > { %1157 = dma.done.wait (%p1025_p8), %s686_s20, 4096  }
  0xcd   : > { %1159 = vsyncadd (%p1025_p8), %s686_s20, 4294963200  ;;  %s1528_s17 = sld [smem:[#allocation11_spill]]  ;;  %p23_p10 = scmp.ge.s32.totalorder %s1222_s18, 4  }
  0xce   : > { %s1529_s15 = sld [smem:[#allocation12_spill]]  ;;  %s1530_s13 = smov %s1166_s14 }
  0xcf   : > { %s1532_s16 = smov %s1222_s18  ;;  %25 = sbr.rel (!%p23_p10) target bundleno = 11 (0xb), region = 132 }
  0xd3   : > { %s1531_s14 = smov %s1528_s17 }
  0xd4   :  { %692 = vsyncpa [#allocation5], 1 }
  0xd5   :  { %694 = vsyncpa [#allocation5 + $0x1], 1 }
  0xd6   :  { %695 = vsyncpa [#allocation6], 1 }
  0xd7   :  { %697 = vsyncpa [#allocation6 + $0x1], 1 }

</bundles_post_ra>
